<compile_context>
chip_gen: v6e
topology: v6e:2x2x1
jax: 0.10.0
libtpu: 0.0.40
codegen_flags: <defaults>
</compile_context>

<pallas_src>
import jax
import jax.numpy as jnp
from jax.experimental import pallas as pl
from jax.experimental.pallas import tpu as pltpu

# ---- problem sizes (small, TPU friendly) -----------------------------------
DW = 32    # word-input dim of w_i
H = 32     # hidden_size  (4*H = 128 -> lane-aligned gate block)
E = 32     # sv / a embedding dim
A = 32     # attention hidden dim (columns of Wha)
V = 128    # output vocabulary size (columns of Who)

LANE = 128
GATES = 4 * H              # 128
W1_N = GATES + A           # fused weight columns: [gates(128) | attn(32)] = 160
W2_ROWS = E + H            # [Wgate rows for da (32) ; Who (32)] = 64

# state-slab lane layout (VMEM scratch AND fused-matmul LHS): [w | h | sv | c]
_W0, _H0, _SV0, _C0 = 0, DW, DW + H, DW + H + E      # 0, 32, 64, 96


def decoder_seq_kernel(x_ref, oh_ref, init_ref, vha_ref, w1_ref, w2_ref,
                       out_ref, st_ref):
    t = pl.program_id(1)
    bf16 = jnp.bfloat16

    # New stream: load initial [0 | h0 | 0 | c0] into the carried state slab.
    @pl.when(t == 0)
    def _():
        st_ref[...] = init_ref[0]

    x = x_ref[0, 0]                                   # (B,128): [relu(w)|sv|a|0]
    b = x.shape[0]

    # Refresh per-step lanes of the operand slab (h/c lanes carry over).
    st_ref[:, _W0:_W0 + DW] = x[:, 0:DW]              # w lanes (ReLU done in wrapper)
    st_ref[:, _SV0:_SV0 + E] = x[:, DW:DW + E]        # sv lanes
    a_emb = x[:, DW + E:DW + 2 * E]                   # (B,E)

    xa = st_ref[...]                                  # (B,128) = [w|h_tm1|sv|c_tm1]
    c_tm1 = xa[:, _C0:_C0 + H]

    # One fused K=128 matmul: [w|h|sv|c] @ [Wgate_{w,h} | Wha_{w,h,sv}] -> (B,160)
    pre = jnp.dot(xa.astype(bf16), w1_ref[...],
                  preferred_element_type=jnp.float32)
    gates_wh = pre[:, :GATES]                         # w/h gate contribution (B,128)
    attn_pre = pre[:, GATES:GATES + A]                # [w,h,sv] @ Wha        (B,32)

    # WenAttn.attend: score = tanh(state @ Wha) @ Vha (VPU mul + lane reduce)
    score = jnp.sum(jnp.tanh(attn_pre) * vha_ref[...], axis=1, keepdims=True)  # (B,1)

    # sv_emb_t = score @ sv_emb (sublane reduce), da = tanh(a + sv_t)
    sv = xa[:, _SV0:_SV0 + E]
    sv_t = jnp.sum(score * sv, axis=0, keepdims=True)                           # (1,E)
    da = jnp.tanh(a_emb + sv_t)                                                  # (B,E)

    # WenLSTM: gates = [w, h, da] @ Wgate
    gates = gates_wh + jnp.dot(da.astype(bf16), w2_ref[:E, :],
                               preferred_element_type=jnp.float32)              # (B,128)

    # Full-vreg nonlinearities: 2 EUP passes cover all four gate groups.
    sg = jax.nn.sigmoid(gates)
    tg = jnp.tanh(gates)
    ig, fg, og = sg[:, :H], sg[:, H:2 * H], sg[:, 2 * H:3 * H]
    cx = tg[:, 3 * H:]

    c_t = ig * cx + fg * c_tm1
    h_t = og * jnp.tanh(c_t)

    # p_t = softmax(h_t @ Who)[b, y_b] without materializing normalized o_t.
    logits = jnp.dot(h_t.astype(bf16), w2_ref[E:E + H, :],
                     preferred_element_type=jnp.float32)                        # (B,V)
    logits = logits - jnp.max(logits, axis=1, keepdims=True)
    ex = jnp.exp(logits)
    num = jnp.sum(ex * oh_ref[0, 0], axis=1, keepdims=True)                     # (B,1)
    den = jnp.sum(ex, axis=1, keepdims=True)                                    # (B,1)
    p_t = num * pl.reciprocal(den)                    # exact reciprocal

    # Carry recurrent state for the next step.
    st_ref[:, _H0:_H0 + H] = h_t
    st_ref[:, _C0:_C0 + H] = c_t

    # Lane-dense 128-lane output slab: [h_t | c_t | p_t broadcast over 64 lanes]
    out_ref[0, 0] = jnp.concatenate(
        [h_t, c_t, jnp.broadcast_to(p_t, (b, 2 * H))], axis=1)


def pack_params(params):
    """Pack the parameters into lane-dense slabs once (outside the hot loop)."""
    Wgate, Who = params["Wgate"], params["Who"]
    Wha, Vha = params["Wha"], params["Vha"]
    f32 = jnp.float32

    # W1 rows follow the state-slab lanes [w|h|sv|c]; cols = [gates(128)|attn(32)].
    gate_block = jnp.concatenate(
        [Wgate[:DW + H], jnp.zeros((E + H, GATES), f32)], axis=0)   # (128,128) sv/c rows = 0
    attn_block = jnp.concatenate(
        [Wha, jnp.zeros((H, A), f32)], axis=0)                      # (128,32)  c rows = 0
    w1 = jnp.concatenate([gate_block, attn_block], axis=1).astype(jnp.bfloat16)  # (128,160)

    # W2 rows: [Wgate rows for da (E) ; Who (H)]
    w2 = jnp.concatenate([Wgate[DW + H:], Who], axis=0).astype(jnp.bfloat16)     # (64,128)

    vha = Vha.reshape(1, A).astype(f32)   # stays f32 (used on the VPU path)
    return {"w1": w1, "w2": w2, "vha": vha}


def decoder_rnn_sequence(w_seq, y_seq, h0, c0, a_seq, sv_seq, packed):
    """Run DecoderRNN.forward over S independent streams for T steps in ONE
    pallas_call: weights are VMEM-resident, h/c are carried in VMEM scratch."""
    S, T, Bq, _ = w_seq.shape
    f32 = jnp.float32

    # Hoisted prep: ReLU(w) once, lane-dense per-step slab, one-hot(y).
    pad = jnp.zeros((S, T, Bq, LANE - DW - 2 * E), f32)
    x = jnp.concatenate([jnp.maximum(w_seq, 0.0), sv_seq, a_seq, pad], axis=-1)  # (S,T,B,128)
    onehot = jax.nn.one_hot(y_seq, V, dtype=f32)                                 # (S,T,B,V)
    init = jnp.concatenate(
        [jnp.zeros((S, Bq, DW), f32), h0, jnp.zeros((S, Bq, E), f32), c0],
        axis=-1)                                                                 # (S,B,128)

    grid_spec = pltpu.PrefetchScalarGridSpec(
        num_scalar_prefetch=0,
        grid=(S, T),                                  # streams (parallel) x time (arbitrary)
        in_specs=[
            pl.BlockSpec((1, 1, Bq, LANE), lambda s, t: (s, t, 0, 0)),  # x slab (per step)
            pl.BlockSpec((1, 1, Bq, V),    lambda s, t: (s, t, 0, 0)),  # one-hot(y) (per step)
            pl.BlockSpec((1, Bq, LANE),    lambda s, t: (s, 0, 0)),     # init h/c (per stream)
            pl.BlockSpec((1, A),           lambda s, t: (0, 0)),        # Vha  (resident)
            pl.BlockSpec((LANE, W1_N),     lambda s, t: (0, 0)),        # W1   (resident)
            pl.BlockSpec((W2_ROWS, LANE),  lambda s, t: (0, 0)),        # W2   (resident)
        ],
        out_specs=pl.BlockSpec((1, 1, Bq, LANE), lambda s, t: (s, t, 0, 0)),
        scratch_shapes=[pltpu.VMEM((Bq, LANE), f32)],  # carried [w|h|sv|c] slab
    )
    out = pl.pallas_call(
        decoder_seq_kernel,
        out_shape=jax.ShapeDtypeStruct((S, T, Bq, LANE), f32),
        grid_spec=grid_spec,
        compiler_params=pltpu.CompilerParams(
            dimension_semantics=("parallel", "arbitrary")),
    )(x, onehot, init, packed["vha"], packed["w1"], packed["w2"])

    h_t = out[..., :H]              # (S,T,B,H)
    c_t = out[..., H:2 * H]         # (S,T,B,H)
    p_t = out[..., 2 * H]           # (S,T,B)  (p broadcast over lanes 64:128)
    return h_t, c_t, p_t


def init_params(key):
    ks = jax.random.split(key, 4)
    s = 0.1
    return {
        "Wgate": s * jax.random.normal(ks[0], (DW + H + E, GATES), jnp.float32),
        "Who":   s * jax.random.normal(ks[1], (H, V), jnp.float32),
        "Wha":   s * jax.random.normal(ks[2], (DW + H + E, A), jnp.float32),
        "Vha":   s * jax.random.normal(ks[3], (A,), jnp.float32),
    }


def _reference(w_seq, y_seq, h0, c0, a_seq, sv_seq, p):
    """Pure-JAX f32 reference of the same interpretation (sanity check)."""
    S, T, Bq, _ = w_seq.shape
    hs, cs, ps = [], [], []
    for s in range(S):
        h, c = h0[s], c0[s]
        hr, cr, pr = [], [], []
        for t in range(T):
            w = jnp.maximum(w_seq[s, t], 0.0)
            sv, a = sv_seq[s, t], a_seq[s, t]
            state = jnp.concatenate([w, h, sv], axis=1)
            score = jnp.tanh(state @ p["Wha"]) @ p["Vha"]        # (B,)
            sv_t = score @ sv                                    # (E,)
            da = jnp.tanh(a + sv_t)
            gates = jnp.concatenate([w, h, da], axis=1) @ p["Wgate"]
            ig = jax.nn.sigmoid(gates[:, :H])
            fg = jax.nn.sigmoid(gates[:, H:2 * H])
            og = jax.nn.sigmoid(gates[:, 2 * H:3 * H])
            cx = jnp.tanh(gates[:, 3 * H:])
            c = ig * cx + fg * c
            h = og * jnp.tanh(c)
            o = jax.nn.softmax(h @ p["Who"], axis=1)
            pt = o[jnp.arange(Bq), y_seq[s, t]]
            hr.append(h); cr.append(c); pr.append(pt)
        hs.append(jnp.stack(hr)); cs.append(jnp.stack(cr)); ps.append(jnp.stack(pr))
    return jnp.stack(hs), jnp.stack(cs), jnp.stack(ps)


if __name__ == "__main__":
    S, T, B = 2, 8, 8   # streams, decode steps, batch ("NetModel.db")
    key = jax.random.PRNGKey(0)
    kp, k1, k2, k3, k4, k5, k6 = jax.random.split(key, 7)
    params = init_params(kp)
    packed = pack_params(params)

    w_seq = jax.random.normal(k1, (S, T, B, DW), jnp.float32)
    y_seq = jax.random.randint(k2, (S, T, B), 0, V, jnp.int32)
    h0 = jax.random.normal(k3, (S, B, H), jnp.float32)
    c0 = jax.random.normal(k4, (S, B, H), jnp.float32)
    a_seq = jax.random.normal(k5, (S, T, B, E), jnp.float32)
    sv_seq = jax.random.normal(k6, (S, T, B, E), jnp.float32)

    fwd = jax.jit(decoder_rnn_sequence)
    h_t, c_t, p_t = fwd(w_seq, y_seq, h0, c0, a_seq, sv_seq, packed)
    jax.block_until_ready((h_t, c_t, p_t))

    hr, cr, pr = _reference(w_seq, y_seq, h0, c0, a_seq, sv_seq, params)
    assert h_t.shape == (S, T, B, H) and c_t.shape == (S, T, B, H)
    assert p_t.shape == (S, T, B)
    # bf16 MXU operands (per perf review) -> moderately loose tolerance vs the
    # f32 reference; values are tanh/sigmoid-bounded so atol is the right knob.
    assert jnp.allclose(h_t, hr, atol=2e-2), f"h_t mismatch {jnp.max(jnp.abs(h_t - hr))}"
    assert jnp.allclose(c_t, cr, atol=2e-2), f"c_t mismatch {jnp.max(jnp.abs(c_t - cr))}"
    assert jnp.allclose(p_t, pr, rtol=5e-2, atol=1e-3), \
        f"p_t mismatch {jnp.max(jnp.abs(p_t - pr))}"

    print("KERNEL_OK")
</pallas_src>

<mosaic_0001>
module attributes {stable_mosaic.version = 11 : i64} {
  func.func @decoder_seq_kernel(%arg0: i32, %arg1: i32, %arg2: memref<1x1x8x128xf32, #tpu.memory_space<vmem>>, %arg3: memref<1x1x8x128xf32, #tpu.memory_space<vmem>>, %arg4: memref<1x8x128xf32, #tpu.memory_space<vmem>>, %arg5: memref<1x32xf32, #tpu.memory_space<vmem>>, %arg6: memref<128x160xbf16, #tpu.memory_space<vmem>>, %arg7: memref<64x128xbf16, #tpu.memory_space<vmem>>, %arg8: memref<1x1x8x128xf32, #tpu.memory_space<vmem>>, %arg9: memref<8x128xf32, #tpu.memory_space<vmem>>) attributes {dimension_semantics = [#tpu.dimension_semantics<parallel>, #tpu.dimension_semantics<arbitrary>], iteration_bounds = array<i64: 2, 8>, scalar_prefetch = 0 : i64, scratch_operands = 1 : i64, tpu.core_type = #tpu.core_type<tc>, window_params = [{transform_indices = @transform_0, window_bounds = array<i64: 1, 1, 8, 128>}, {transform_indices = @transform_1, window_bounds = array<i64: 1, 1, 8, 128>}, {transform_indices = @transform_2, window_bounds = array<i64: 1, 8, 128>}, {pipeline_mode = #tpu.pipeline_mode<synchronous>, transform_indices = @transform_3, window_bounds = array<i64: 1, 32>}, {pipeline_mode = #tpu.pipeline_mode<synchronous>, transform_indices = @transform_4, window_bounds = array<i64: 128, 160>}, {pipeline_mode = #tpu.pipeline_mode<synchronous>, transform_indices = @transform_5, window_bounds = array<i64: 64, 128>}, {transform_indices = @transform_6, window_bounds = array<i64: 1, 1, 8, 128>}]} {
    %c0_i32 = arith.constant 0 : i32
    %0 = arith.cmpi eq, %arg1, %c0_i32 : i32
    %1 = arith.extui %0 : i1 to i32
    %c0_i32_0 = arith.constant 0 : i32
    %2 = arith.cmpi ne, %1, %c0_i32_0 : i32
    scf.if %2 {
      %c0_35 = arith.constant 0 : index
      %c0_36 = arith.constant 0 : index
      %c0_37 = arith.constant 0 : index
      %75 = vector.load %arg4[%c0_35, %c0_36, %c0_37] : memref<1x8x128xf32, #tpu.memory_space<vmem>>, vector<1x8x128xf32>
      %76 = vector.shape_cast %75 : vector<1x8x128xf32> to vector<8x128xf32>
      %c0_38 = arith.constant 0 : index
      %c0_39 = arith.constant 0 : index
      %77 = vector.load %arg9[%c0_38, %c0_39] : memref<8x128xf32, #tpu.memory_space<vmem>>, vector<8x128xf32>
      tpu.vector_store %arg9[%c0_38, %c0_39], %76 {strides = array<i32>} : memref<8x128xf32, #tpu.memory_space<vmem>>, vector<8x128xf32>,
    } else {
    }
    %c0 = arith.constant 0 : index
    %c0_1 = arith.constant 0 : index
    %c0_2 = arith.constant 0 : index
    %c0_3 = arith.constant 0 : index
    %3 = vector.load %arg2[%c0, %c0_1, %c0_2, %c0_3] : memref<1x1x8x128xf32, #tpu.memory_space<vmem>>, vector<1x1x8x128xf32>
    %4 = vector.shape_cast %3 : vector<1x1x8x128xf32> to vector<8x128xf32>
    %5 = vector.extract_strided_slice %4 {offsets = [0, 0], sizes = [8, 32], strides = [1, 1]} : vector<8x128xf32> to vector<8x32xf32>
    %c0_4 = arith.constant 0 : index
    %c0_5 = arith.constant 0 : index
    %6 = vector.load %arg9[%c0_4, %c0_5] : memref<8x128xf32, #tpu.memory_space<vmem>>, vector<8x32xf32>
    tpu.vector_store %arg9[%c0_4, %c0_5], %5 {strides = array<i32>} : memref<8x128xf32, #tpu.memory_space<vmem>>, vector<8x32xf32>,
    %7 = vector.extract_strided_slice %4 {offsets = [0, 32], sizes = [8, 32], strides = [1, 1]} : vector<8x128xf32> to vector<8x32xf32>
    %c0_6 = arith.constant 0 : index
    %c64 = arith.constant 64 : index
    %8 = vector.load %arg9[%c0_6, %c64] : memref<8x128xf32, #tpu.memory_space<vmem>>, vector<8x32xf32>
    tpu.vector_store %arg9[%c0_6, %c64], %7 {strides = array<i32>} : memref<8x128xf32, #tpu.memory_space<vmem>>, vector<8x32xf32>,
    %9 = vector.extract_strided_slice %4 {offsets = [0, 64], sizes = [8, 32], strides = [1, 1]} : vector<8x128xf32> to vector<8x32xf32>
    %c0_7 = arith.constant 0 : index
    %c0_8 = arith.constant 0 : index
    %10 = vector.load %arg9[%c0_7, %c0_8] : memref<8x128xf32, #tpu.memory_space<vmem>>, vector<8x128xf32>
    %11 = vector.extract_strided_slice %10 {offsets = [0, 96], sizes = [8, 32], strides = [1, 1]} : vector<8x128xf32> to vector<8x32xf32>
    %12 = arith.truncf %10 : vector<8x128xf32> to vector<8x128xbf16>
    %c0_9 = arith.constant 0 : index
    %c0_10 = arith.constant 0 : index
    %13 = vector.load %arg6[%c0_9, %c0_10] : memref<128x160xbf16, #tpu.memory_space<vmem>>, vector<128x160xbf16>
    %cst = arith.constant dense<0.000000e+00> : vector<8x160xf32>
    %14 = tpu.matmul %12, %13, %cst {dimension_numbers = #tpu.dot_dimension_numbers<[1], [0], [0], [1], [0, 0, 1, 1], [], []>} : vector<8x128xbf16>, vector<128x160xbf16>, vector<8x160xf32> -> vector<8x160xf32>
    %15 = vector.extract_strided_slice %14 {offsets = [0, 0], sizes = [8, 128], strides = [1, 1]} : vector<8x160xf32> to vector<8x128xf32>
    %16 = vector.extract_strided_slice %14 {offsets = [0, 128], sizes = [8, 32], strides = [1, 1]} : vector<8x160xf32> to vector<8x32xf32>
    %17 = math.tanh %16 : vector<8x32xf32>
    %c0_11 = arith.constant 0 : index
    %c0_12 = arith.constant 0 : index
    %18 = vector.load %arg5[%c0_11, %c0_12] : memref<1x32xf32, #tpu.memory_space<vmem>>, vector<1x32xf32>
    %19 = vector.broadcast %18 : vector<1x32xf32> to vector<8x32xf32>
    %20 = arith.mulf %17, %19 : vector<8x32xf32>
    %cst_13 = arith.constant dense<0.000000e+00> : vector<8xf32>
    %21 = vector.multi_reduction <add>, %20, %cst_13 [1] : vector<8x32xf32> to vector<8xf32>
    %22 = vector.shape_cast %21 : vector<8xf32> to vector<8x1xf32>
    %23 = vector.extract_strided_slice %10 {offsets = [0, 64], sizes = [8, 32], strides = [1, 1]} : vector<8x128xf32> to vector<8x32xf32>
    %24 = vector.broadcast %22 : vector<8x1xf32> to vector<8x32xf32>
    %25 = arith.mulf %24, %23 : vector<8x32xf32>
    %cst_14 = arith.constant dense<0.000000e+00> : vector<32xf32>
    %26 = vector.multi_reduction <add>, %25, %cst_14 [0] : vector<8x32xf32> to vector<32xf32>
    %27 = vector.shape_cast %26 : vector<32xf32> to vector<1x32xf32>
    %28 = vector.broadcast %27 : vector<1x32xf32> to vector<8x32xf32>
    %29 = arith.addf %9, %28 : vector<8x32xf32>
    %30 = math.tanh %29 : vector<8x32xf32>
    %31 = arith.truncf %30 : vector<8x32xf32> to vector<8x32xbf16>
    %c0_15 = arith.constant 0 : index
    %c0_16 = arith.constant 0 : index
    %32 = vector.load %arg7[%c0_15, %c0_16] : memref<64x128xbf16, #tpu.memory_space<vmem>>, vector<32x128xbf16>
    %cst_17 = arith.constant dense<0.000000e+00> : vector<8x128xf32>
    %33 = tpu.matmul %31, %32, %cst_17 {dimension_numbers = #tpu.dot_dimension_numbers<[1], [0], [0], [1], [0, 0, 1, 1], [], []>} : vector<8x32xbf16>, vector<32x128xbf16>, vector<8x128xf32> -> vector<8x128xf32>
    %34 = arith.addf %15, %33 : vector<8x128xf32>
    %35 = arith.negf %34 : vector<8x128xf32>
    %36 = math.exp %35 : vector<8x128xf32>
    %cst_18 = arith.constant 1.000000e+00 : f32
    %37 = vector.broadcast %cst_18 : f32 to vector<8x128xf32>
    %38 = arith.addf %37, %36 : vector<8x128xf32>
    %39 = arith.divf %37, %38 : vector<8x128xf32>
    %40 = math.tanh %34 : vector<8x128xf32>
    %41 = vector.extract_strided_slice %39 {offsets = [0, 0], sizes = [8, 32], strides = [1, 1]} : vector<8x128xf32> to vector<8x32xf32>
    %42 = vector.extract_strided_slice %39 {offsets = [0, 32], sizes = [8, 32], strides = [1, 1]} : vector<8x128xf32> to vector<8x32xf32>
    %43 = vector.extract_strided_slice %39 {offsets = [0, 64], sizes = [8, 32], strides = [1, 1]} : vector<8x128xf32> to vector<8x32xf32>
    %44 = vector.extract_strided_slice %40 {offsets = [0, 96], sizes = [8, 32], strides = [1, 1]} : vector<8x128xf32> to vector<8x32xf32>
    %45 = arith.mulf %41, %44 : vector<8x32xf32>
    %46 = arith.mulf %42, %11 : vector<8x32xf32>
    %47 = arith.addf %45, %46 : vector<8x32xf32>
    %48 = math.tanh %47 : vector<8x32xf32>
    %49 = arith.mulf %43, %48 : vector<8x32xf32>
    %50 = arith.truncf %49 : vector<8x32xf32> to vector<8x32xbf16>
    %c32 = arith.constant 32 : index
    %c0_19 = arith.constant 0 : index
    %51 = vector.load %arg7[%c32, %c0_19] : memref<64x128xbf16, #tpu.memory_space<vmem>>, vector<32x128xbf16>
    %cst_20 = arith.constant dense<0.000000e+00> : vector<8x128xf32>
    %52 = tpu.matmul %50, %51, %cst_20 {dimension_numbers = #tpu.dot_dimension_numbers<[1], [0], [0], [1], [0, 0, 1, 1], [], []>} : vector<8x32xbf16>, vector<32x128xbf16>, vector<8x128xf32> -> vector<8x128xf32>
    %cst_21 = arith.constant dense<0xFF800000> : vector<8xf32>
    %53 = vector.multi_reduction <maximumf>, %52, %cst_21 [1] : vector<8x128xf32> to vector<8xf32>
    %54 = vector.shape_cast %53 : vector<8xf32> to vector<8x1xf32>
    %55 = vector.broadcast %54 : vector<8x1xf32> to vector<8x128xf32>
    %56 = arith.subf %52, %55 : vector<8x128xf32>
    %57 = math.exp %56 : vector<8x128xf32>
    %c0_22 = arith.constant 0 : index
    %c0_23 = arith.constant 0 : index
    %c0_24 = arith.constant 0 : index
    %c0_25 = arith.constant 0 : index
    %58 = vector.load %arg3[%c0_22, %c0_23, %c0_24, %c0_25] : memref<1x1x8x128xf32, #tpu.memory_space<vmem>>, vector<1x1x8x128xf32>
    %59 = vector.shape_cast %58 : vector<1x1x8x128xf32> to vector<8x128xf32>
    %60 = arith.mulf %57, %59 : vector<8x128xf32>
    %cst_26 = arith.constant dense<0.000000e+00> : vector<8xf32>
    %61 = vector.multi_reduction <add>, %60, %cst_26 [1] : vector<8x128xf32> to vector<8xf32>
    %62 = vector.shape_cast %61 : vector<8xf32> to vector<8x1xf32>
    %cst_27 = arith.constant dense<0.000000e+00> : vector<8xf32>
    %63 = vector.multi_reduction <add>, %57, %cst_27 [1] : vector<8x128xf32> to vector<8xf32>
    %64 = vector.shape_cast %63 : vector<8xf32> to vector<8x1xf32>
    %65 = tpu.reciprocal %64 : vector<8x1xf32> -> vector<8x1xf32>
    %66 = arith.mulf %62, %65 : vector<8x1xf32>
    %c0_28 = arith.constant 0 : index
    %c32_29 = arith.constant 32 : index
    %67 = vector.load %arg9[%c0_28, %c32_29] : memref<8x128xf32, #tpu.memory_space<vmem>>, vector<8x32xf32>
    tpu.vector_store %arg9[%c0_28, %c32_29], %49 {strides = array<i32>} : memref<8x128xf32, #tpu.memory_space<vmem>>, vector<8x32xf32>,
    %c0_30 = arith.constant 0 : index
    %c96 = arith.constant 96 : index
    %68 = vector.load %arg9[%c0_30, %c96] : memref<8x128xf32, #tpu.memory_space<vmem>>, vector<8x32xf32>
    tpu.vector_store %arg9[%c0_30, %c96], %47 {strides = array<i32>} : memref<8x128xf32, #tpu.memory_space<vmem>>, vector<8x32xf32>,
    %69 = vector.shape_cast %66 : vector<8x1xf32> to vector<8x1xf32>
    %70 = vector.broadcast %69 : vector<8x1xf32> to vector<8x64xf32>
    %71 = tpu.concatenate %49, %47, %70 in 1 : vector<8x32xf32>, vector<8x32xf32>, vector<8x64xf32> -> vector<8x128xf32>
    %c0_31 = arith.constant 0 : index
    %c0_32 = arith.constant 0 : index
    %c0_33 = arith.constant 0 : index
    %c0_34 = arith.constant 0 : index
    %72 = vector.load %arg8[%c0_31, %c0_32, %c0_33, %c0_34] : memref<1x1x8x128xf32, #tpu.memory_space<vmem>>, vector<1x1x8x128xf32>
    %73 = vector.shape_cast %72 : vector<1x1x8x128xf32> to vector<8x128xf32>
    %74 = vector.shape_cast %71 : vector<8x128xf32> to vector<1x1x8x128xf32>
    tpu.vector_store %arg8[%c0_31, %c0_32, %c0_33, %c0_34], %74 {strides = array<i32>} : memref<1x1x8x128xf32, #tpu.memory_space<vmem>>, vector<1x1x8x128xf32>,
    return
  }
  func.func @transform_0(%arg0: i32, %arg1: i32) -> (i32, i32, i32, i32) {
    %c0_i32 = arith.constant 0 : i32
    %c0_i32_0 = arith.constant 0 : i32
    %c0_i32_1 = arith.constant 0 : i32
    return %arg0, %arg1, %c0_i32, %c0_i32_0 : i32, i32, i32, i32
  }
  func.func @transform_1(%arg0: i32, %arg1: i32) -> (i32, i32, i32, i32) {
    %c0_i32 = arith.constant 0 : i32
    %c0_i32_0 = arith.constant 0 : i32
    %c0_i32_1 = arith.constant 0 : i32
    return %arg0, %arg1, %c0_i32, %c0_i32_0 : i32, i32, i32, i32
  }
  func.func @transform_2(%arg0: i32, %arg1: i32) -> (i32, i32, i32) {
    %c0_i32 = arith.constant 0 : i32
    %c0_i32_0 = arith.constant 0 : i32
    %c0_i32_1 = arith.constant 0 : i32
    return %arg0, %c0_i32, %c0_i32_0 : i32, i32, i32
  }
  func.func @transform_3(%arg0: i32, %arg1: i32) -> (i32, i32) {
    %c0_i32 = arith.constant 0 : i32
    %c0_i32_0 = arith.constant 0 : i32
    %c0_i32_1 = arith.constant 0 : i32
    return %c0_i32, %c0_i32_0 : i32, i32
  }
  func.func @transform_4(%arg0: i32, %arg1: i32) -> (i32, i32) {
    %c0_i32 = arith.constant 0 : i32
    %c0_i32_0 = arith.constant 0 : i32
    %c0_i32_1 = arith.constant 0 : i32
    return %c0_i32, %c0_i32_0 : i32, i32
  }
  func.func @transform_5(%arg0: i32, %arg1: i32) -> (i32, i32) {
    %c0_i32 = arith.constant 0 : i32
    %c0_i32_0 = arith.constant 0 : i32
    %c0_i32_1 = arith.constant 0 : i32
    return %c0_i32, %c0_i32_0 : i32, i32
  }
  func.func @transform_6(%arg0: i32, %arg1: i32) -> (i32, i32, i32, i32) {
    %c0_i32 = arith.constant 0 : i32
    %c0_i32_0 = arith.constant 0 : i32
    %c0_i32_1 = arith.constant 0 : i32
    return %arg0, %arg1, %c0_i32, %c0_i32_0 : i32, i32, i32, i32
  }
}

</mosaic_0001>

<bundles_post_ra>
// kernel: decoder_rnn_sequence.1
= control target key start
LH: loop header
LB: loop body
LE: loop exit
PB: predicated region body
PF: predicated region fallthrough
CT: control target
= control target key end

     0   :  { %s1046_s21 = smov 0   ;;  %s1048_s22 = smov 0   ;;  %s1206_s0 = inlined_call_operand.vmem [shape: f32[2,8,8,128], index: 0, kind: input, shape index: {}]   ;;  %s1207_s1 = inlined_call_operand.vmem [shape: f32[2,8,8,128], index: 1, kind: input, shape index: {}]   ;;  %s1208_s2 = inlined_call_operand.vmem [shape: f32[2,8,128], index: 2, kind: input, shape index: {}]   ;;  %s1209_s3 = inlined_call_operand.vmem [shape: f32[1,32], index: 3, kind: input, shape index: {}]   ;;  %s1210_s4 = inlined_call_operand.vmem [shape: bf16[128,160], index: 4, kind: input, shape index: {}]   ;;  %s1211_s5 = inlined_call_operand.vmem [shape: bf16[64,128], index: 5, kind: input, shape index: {}]   ;;  %s1212_s6 = inlined_call_operand.vmem [shape: f32[2,8,8,128], index: 6, kind: output, shape index: {}]  }
   0x1   :  { %s1050_s23 = smov 0   ;;  %s1052_s24 = smov 0  }
   0x2   :  { %s1054_s25 = smov 0  }
   0x3 LB: > { %s25_s26 = sadd.s32 1, %s995_s23  ;;  %s28_s27 = sadd.s32 1, %s999_s24  ;;  %s1003_s25 = sphi %s1054_s25, %s16_s25   ;;  %s999_s24 = sphi %s1052_s24, %s1216_s24   ;;  %s995_s23 = sphi %s1050_s23, %s1215_s23   ;;  %s991_s22 = sphi %s1048_s22, %s1214_s22   ;;  %s987_s21 = sphi %s1046_s21, %s1213_s21  }
   0x4   : > { %p26_p0 = scmp.ge.s32.totalorder %s25_s26, 8  ;;  %p818_p1 = scmp.ge.s32.totalorder %s1003_s25, 1 }
   0x5   : > { %p255_p2 = scmp.lt.s32.totalorder %s1003_s25, 17 }
   0x6   : > { %s1218_s26 = smov (%p26_p0, %s25_s26), 0  ;;  %s1220_s27 = smov (!%p26_p0, %s28_s27), %s999_s24 }
   0x7   : > { %p256_p3 = pnand %p818_p1, %p255_p2  ;;  %p30_p4 = scmp.ge.s32.totalorder %s1220_s27, 2 }
   0x8   : > { %p303_p5 = scmp.lt.s32.totalorder (!%p256_p3), %s991_s22, 1  ;;  %p305_p6 = scmp.lt.s32.totalorder (!%p256_p3), %s987_s21, 7 }
   0x9   : > { %s1222_s27 = smov (%p30_p4, %s1220_s27), 0  ;;  %259 = sbr.rel (%p256_p3) target bundleno = 1746 (0x6d2), region = 44 }
   0xa   : > { %p826_p7 = scmp.ne.s32.totalorder (!%p256_p3), %s987_s21, 0 }
   0xe   : > { %s1224_s22 = smov (!%p303_p5, %s991_s22), 1 }
   0xf   : > { %s306_s28 = scalar_select %p305_p6, %s987_s21, 7 }
  0x10   : > { %s819_s29 = sshll.u32 %s1224_s22, 3  ;;  %335 = sbr.rel (%p826_p7) target bundleno = 23 (0x17), region = 48 }
  0x11   : > { %s308_s30 = sadd.s32 %s819_s29, %s306_s28  ;;  %s322_s9 = scalar_lea.vmem %s1208_s2, %s819_s29 }
  0x12   : > { %s1079_s10 = sshll.u32 %s308_s30, 3 }
  0x13   : > { %s310_s13 = scalar_lea.vmem %s1206_s0, %s1079_s10  ;;  %s318_s16 = scalar_lea.vmem %s1207_s1, %s1079_s10 }
  0x14   : > { %s330_s19 = scalar_lea.vmem %s1212_s6, %s1079_s10 }
  0x15   : > { %v336_v0 = vld [vmem:[%s322_s9] sm:$0xff] }
  0x16   : > { %337 = vst [vmem:[#allocation2] sm:$0xff] %v336_v0 }
  0x17 PF: > { %v1093_v1 = vld [vmem:[%s310_s13] sm:$0xff]  ;;  %vm339_vm0 = vcmask 261120   ;;  %s1005_s20 = smov 32   ;;  %v921_v2 = vld [vmem:[%s1210_s4 + $0x74] ss:$8 sps:$4 sm:$0xff]   ;;  %v1006_v5 = vmov 0  }
  0x18   : > { %342 = vrot.lane.b32.xlu0 %v1093_v1, %s1005_s20  ;;  %v923_v3 = vld [vmem:[%s1210_s4 + $0x70] ss:$8 sps:$4 sm:$0xff]   ;;  %340 = vst.msk [vmem:[#allocation2] sm:$0xff] %vm339_vm0, %v1093_v1  ;;  %v924_v4 = vld [vmem:[%s1210_s4 + $0x64] ss:$8 sps:$4 sm:$0xff]   ;;  %477 = vmatprep.mubr.bf16.mxu0 %v1006_v5  ;;  %vm345_vm1 = vcmask 785920  }
  0x19   : > { %445 = vmatprep.subr.bf16.mxu0 %v921_v2  ;;  %v926_v6 = vld [vmem:[%s1210_s4 + $0x60] ss:$8 sps:$4 sm:$0xff]   ;;  %v927_v7 = vld [vmem:[%s1210_s4 + $0x54] ss:$8 sps:$4 sm:$0xff]   ;;  %v929_v8 = vld [vmem:[%s1210_s4 + $0x50] ss:$8 sps:$4 sm:$0xff]  }
  0x1a   : > { %446 = vmatpush1.bf16.msra.mxu0 %v923_v3  ;;  %v930_v9 = vld [vmem:[%s1210_s4 + $0x44] ss:$8 sps:$4 sm:$0xff]   ;;  %v932_v10 = vld [vmem:[%s1210_s4 + $0x40] ss:$8 sps:$4 sm:$0xff]   ;;  %v933_v11 = vld [vmem:[%s1210_s4 + $0x34] ss:$8 sps:$4 sm:$0xff]  }
  0x1b   : > { %447 = vmatprep.subr.bf16.mxu0 %v924_v4  ;;  %v935_v12 = vld [vmem:[%s1210_s4 + $0x30] ss:$8 sps:$4 sm:$0xff]   ;;  %v936_v13 = vld [vmem:[%s1210_s4 + $0x24] ss:$8 sps:$4 sm:$0xff]   ;;  %v938_v14 = vld [vmem:[%s1210_s4 + $0x20] ss:$8 sps:$4 sm:$0xff]  }
  0x1c   : > { %v939_v15 = vld [vmem:[%s1210_s4 + $0x14] ss:$8 sps:$4 sm:$0xff]   ;;  %v941_v16 = vld [vmem:[%s1210_s4 + $0x10] ss:$8 sps:$4 sm:$0xff]   ;;  %v942_v17 = vld [vmem:[%s1210_s4 + $0x4] ss:$8 sps:$4 sm:$0xff]  }
  0x1d   : > { %v944_v18 = vld [vmem:[%s1210_s4] ss:$8 sps:$4 sm:$0xff]   ;;  %v1007_v31 = vmov 0.0   ;;  %vm1008_vm2 = vmmov 0   ;;  %s1009_s11 = smov 64   ;;  %s1010_s12 = smov 96  }
  0x1e   : > { %448 = vmatpush1.bf16.msra.mxu0 %v926_v6  ;;  %v843_v26 = vld [vmem:[%s1209_s3] ss:$0 sm:$0xff]  ;;  %v945_v30 = vld [vmem:[%s1211_s5 + $0x8] sm:$0xff]   ;;  %859 = vmatprep.subr.bf16.mxu1 %v1007_v31  ;;  %v947_v62 = vld [vmem:[%s1211_s5 + $0x18] sm:$0xff]   ;;  %vm680_vm3 = vcmask 523520   ;;  %vm686_vm4 = vcmask 1048320  }
  0x1f   : > { %449 = vmatprep.subr.bf16.mxu0 %v927_v7  ;;  %863 = vmatprep.mubr.msk.bf16.mxu1 %vm1008_vm2, %v1007_v31  ;;  %v946_v32 = vld [vmem:[%s1211_s5] sm:$0xff]   ;;  %v948_v63 = vld [vmem:[%s1211_s5 + $0x10] sm:$0xff]   ;;  %vm695_vm5 = vcmask 523264  }
  0x20   : > { %860 = vmatpush3.bf16.msra.mxu1 %v945_v30 }
  0x21   : > { %861 = vmatprep.subr.bf16.mxu1 %v1007_v31 }
  0x22   : > { %450 = vmatpush1.bf16.msra.mxu0 %v929_v8 }
  0x23   : > { %451 = vmatprep.subr.bf16.mxu0 %v930_v9 }
  0x24   : > { %862 = vmatpush3.bf16.msra.mxu1 %v946_v32 }
  0x25   : > { %867 = vmatprep.subr.bf16.mxu1 %v1007_v31 }
  0x26   : > { %452 = vmatpush1.bf16.msra.mxu0 %v932_v10 }
  0x27   : > { %453 = vmatprep.subr.bf16.mxu0 %v933_v11 }
  0x2a   : > { %454 = vmatpush1.bf16.msra.mxu0 %v935_v12 }
  0x2b   : > { %455 = vmatprep.subr.bf16.mxu0 %v936_v13 }
  0x2e   : > { %456 = vmatpush1.bf16.msra.mxu0 %v938_v14 }
  0x2f   : > { %457 = vmatprep.subr.bf16.mxu0 %v939_v15  ;;  %v668_v15 = vld [vmem:[%s318_s16] sm:$0xff] }
  0x32   : > { %458 = vmatpush1.bf16.msra.mxu0 %v941_v16 }
  0x33   : > { %459 = vmatprep.subr.bf16.mxu0 %v942_v17 }
  0x36   : > { %460 = vmatpush1.bf16.msra.mxu0 %v944_v18 }
  0x8a   : > { %v343_v19 = vpop.permute.xlu0 %342 }
  0x8b   : > { %346 = vst.msk [vmem:[#allocation2] sm:$0xff] %vm345_vm1, %v343_v19 }
  0x92   : > { %v347_v20 = vld [vmem:[#allocation2] sm:$0xff] }
  0x93   : > { %v348_v21 = vpack.c.bf16 %v347_v20, %v347_v20 }
  0x95   : > { %478 = vmatmul.mubr.bf16.vlgmr.msra.gmra.mxu0 %v348_v21 }
 0x155   : > { %v479_v22 = vpop.f32.mrf.mxu0 }
 0x157   : > { %v481_v23 = vpop.f32.mrf.mxu0 }
 0x158   : > { %949 = vtanh.f32 %v481_v23 }
 0x159   : > { %v483_v24 = vpop.f32.mrf.mxu0 }
 0x15b   : > { %v484_v25 = vpop.f32.mrf.mxu0 }
 0x165   : > { %v950_v27 = vpop.eup %949 }
 0x166   : > { %v494_v28 = vmul.f32 %v950_v27, %v843_v26 }
 0x168   : > { %v495_v29 = vsel %vm339_vm0, %v494_v28, 0.0 }
 0x169   : > { %496 = vadd.xlane.f32.xlu0 %v495_v29 }
 0x1f2   : > { %v497_v33 = vpop.xlane.xlu0 %496 }
 0x1f3   : > { %v498_v34 = vmul.f32 %v497_v33, %v347_v20 }
 0x1f5   : > { %v499_v35 = vsel %vm345_vm1, %v498_v34, 0.0 }
 0x1f6   : > { %v500_v36 = vrot.slane %v499_v35, 4 }
 0x1f8   : > { %v501_v37 = vadd.f32 %v500_v36, %v499_v35 }
 0x1fa   : > { %v502_v38 = vrot.slane %v501_v37, 2 }
 0x1fc   : > { %v503_v39 = vadd.f32 %v502_v38, %v501_v37 }
 0x1fe   : > { %v504_v40 = vrot.slane %v503_v39, 1 }
 0x200   : > { %v505_v41 = vadd.f32 %v504_v40, %v503_v39 }
 0x202   : > { %v506_v42 = vadd.f32 %v505_v41, %v1093_v1 }
 0x204   : > { %951 = vtanh.f32 %v506_v42 }
 0x211   : > { %v952_v43 = vpop.eup %951 }
 0x212   : > { %v508_v44 = vpack.c.bf16 %v952_v43, %v952_v43 }
 0x214   : > { %514 = vrot.lane.b32.xlu1 %v508_v44, %s1009_s11 }
 0x218   : > { %585 = vrot.lane.b32.xlu1 %v347_v20, %s1009_s11 }
 0x286   : > { %v515_v45 = vpop.permute.xlu1 %514 }
 0x287   : > { %864 = vmatmul.mubr.msk.bf16.vlgmr.msra.gmra.mxu1 %vm339_vm0, %v515_v45 }
 0x288   : > { %871 = vmatprep.mubr.msk.bf16.mxu1 %vm1008_vm2, %v1007_v31  ;;  %868 = vmatpush3.bf16.msra.mxu1 %v947_v62 }
 0x289   : > { %869 = vmatprep.subr.bf16.mxu1 %v1007_v31 }
 0x28a   : > { %v586_v56 = vpop.permute.xlu1 %585 }
 0x28c   : > { %870 = vmatpush3.bf16.msra.mxu1 %v948_v63 }
 0x347   : > { %v565_v46 = vpop.f32.mrf.mxu1 }
 0x348   : > { %v571_v47 = vadd.f32 %v565_v46, %v479_v22 }
 0x349   : > { %v865_v48 = vpop.f32.mrf.mxu1 }
 0x34a   : > { %v847_v49 = vmul.f32 -1.442695, %v571_v47  ;;  %953 = vtanh.f32 %v571_v47 }
 0x34b   : > { %v568_v50 = vpop.f32.mrf.mxu1 }
 0x34c   : > { %955 = vpow2.f32 %v847_v49 }
 0x34d   : > { %v866_v51 = vpop.f32.mrf.mxu1 }
 0x357   : > { %v954_v52 = vpop.eup %953 }
 0x358   : > { %580 = vrot.lane.b32.xlu1 %v954_v52, %s1005_s20 }
 0x359   : > { %v956_v53 = vpop.eup %955 }
 0x35a   : > { %v575_v54 = vadd.f32 1.0, %v956_v53 }
 0x35c   : > { %957 = vrcp.f32 %v575_v54 }
 0x369   : > { %v958_v55 = vpop.eup %957 }
 0x36a   : > { %v588_v57 = vmul.f32 %v958_v55, %v586_v56 }
 0x36c   : > { %590 = vrot.lane.b32.xlu1 %v588_v57, %s1010_s12 }
 0x3ca   : > { %v581_v58 = vpop.permute.xlu1 %580 }
 0x3cb   : > { %v583_v59 = vmul.f32 %v958_v55, %v581_v58 }
 0x3de   : > { %v591_v60 = vpop.permute.xlu1 %590 }
 0x3df   : > { %v593_v61 = vadd.f32 %v591_v60, %v583_v59 }
 0x3e1   : > { %959 = vtanh.f32 %v593_v61 }
 0x3ee   : > { %v960_v0 = vpop.eup %959 }
 0x3ef   : > { %596 = vrot.lane.b32.xlu1 %v960_v0, %s1009_s11 }
 0x461   : > { %v597_v1 = vpop.permute.xlu1 %596 }
 0x462   : > { %v599_v2 = vmul.f32 %v958_v55, %v597_v1 }
 0x464   : > { %688 = vrot.lane.b32.xlu0 %v599_v2, %s1009_s11  ;;  %v600_v3 = vpack.c.bf16 %v599_v2, %v599_v2 }
 0x466   : > { %606 = vrot.lane.b32.xlu1 %v600_v3, %s1009_s11 }
 0x468   : > { %677 = vrot.lane.b32.xlu0 %v599_v2, %s1010_s12 }
 0x4d6   : > { %v689_v4 = vpop.permute.xlu0 %688 }
 0x4d8   : > { %v607_v5 = vpop.permute.xlu1 %606 }
 0x4d9   : > { %872 = vmatmul.mubr.msk.bf16.vlgmr.msra.gmra.mxu1 %vm339_vm0, %v607_v5 }
 0x4da   : > { %v678_v6 = vpop.permute.xlu0 %677 }
 0x4db   : > { %681 = vst.msk [vmem:[#allocation2] sm:$0xff] %vm680_vm3, %v678_v6 }
 0x599   : > { %v657_v7 = vpop.f32.mrf.mxu1 }
 0x59a   : > { %663 = vmax.xlane.f32.xlu1 %v657_v7 }
 0x59b   : > { %v873_v8 = vpop.f32.mrf.mxu1 }
 0x59d   : > { %v660_v9 = vpop.f32.mrf.mxu1 }
 0x59f   : > { %v874_v10 = vpop.f32.mrf.mxu1 }
 0x5ab   : > { %691 = vrot.lane.b32.xlu1 %v593_v61, %s1005_s20 }
 0x623   : > { %v664_v11 = vpop.xlane.xlu1 %663 }
 0x624   : > { %v665_v12 = vsub.f32 %v657_v7, %v664_v11 }
 0x626   : > { %v666_v13 = vmul.f32 1.442695, %v665_v12 }
 0x627   : > { %v692_v20 = vpop.permute.xlu1 %691 }
 0x628   : > { %961 = vpow2.f32 %v666_v13  ;;  %v694_v23 = vsel %vm339_vm0, %v689_v4, %v692_v20 }
 0x635   : > { %v962_v14 = vpop.eup %961 }
 0x636   : > { %672 = vadd.xlane.f32.xlu0 %v962_v14  ;;  %v669_v16 = vmul.f32 %v962_v14, %v668_v15 }
 0x63a   : > { %670 = vadd.xlane.f32.xlu0 %v669_v16 }
 0x650   : > { %683 = vrot.lane.b32.xlu0 %v593_v61, %s1010_s12 }
 0x6bf   : > { %v673_v17 = vpop.xlane.xlu0 %672 }
 0x6c0   : > { %963 = vrcp.f32 %v673_v17 }
 0x6c3   : > { %v671_v18 = vpop.xlane.xlu0 %670 }
 0x6c7   : > { %v684_v19 = vpop.permute.xlu0 %683 }
 0x6c8   : > { %687 = vst.msk [vmem:[#allocation2] sm:$0xff] %vm686_vm4, %v684_v19 }
 0x6cd   : > { %v964_v21 = vpop.eup %963 }
 0x6ce   : > { %v675_v22 = vmul.f32 %v964_v21, %v671_v18 }
 0x6d0   : > { %v696_v24 = vsel %vm695_vm5, %v694_v23, %v675_v22 }
 0x6d1   : > { %697 = vst [vmem:[%s330_s19] sm:$0xff] %v696_v24 }
 0x6d2 PF: > { %s16_s25 = sadd.s32 1, %s1003_s25   ;;  %s1213_s21 = smov %s995_s23 }
 0x6d3   : > { %p13_p8 = scmp.ge.s32.totalorder %s16_s25, 18   ;;  %s1214_s22 = smov %s999_s24 }
 0x6d4   : > { %s1215_s23 = smov %s1218_s26  ;;  %s1216_s24 = smov %s1222_s27 }
 0x6d5   :  { %15 = sbr.rel (!%p13_p8) target bundleno = 3 (0x3), region = 84 }

</bundles_post_ra>
